<compile_context>
chip_gen: v5e
topology: v5e:2x2
jax: 0.10.0
libtpu: 0.0.40
codegen_flags: <defaults>
</compile_context>

<pallas_src>
import jax
import jax.numpy as jnp
from jax.experimental import pallas as pl
from jax.experimental.pallas import tpu as pltpu

LANE = 128       # vreg lane width: last dim of every block is padded to this
SUBLANE = 8      # vreg sublane count: batch tile must be a multiple of this
NEG_INF = -1e30  # bias for padded output classes -> exp() underflows to 0


def mlp_softmax_kernel(x_ref, w1_ref, b1_ref, w2_ref, b2_ref, w3_ref, b3_ref,
                       o_ref):
    x = x_ref[...]  # (tile_m, D_in_p), matmul dtype (bf16 by default)

    # Layer 1: Linear + ReLU.  MXU matmul with f32 accumulation; bias/ReLU on
    # the VPU in f32.
    z1 = jnp.dot(x, w1_ref[...], preferred_element_type=jnp.float32) + b1_ref[...]
    h1 = jnp.maximum(z1, 0.0).astype(w2_ref.dtype)

    # Layer 2: Linear + ReLU.
    z2 = jnp.dot(h1, w2_ref[...], preferred_element_type=jnp.float32) + b2_ref[...]
    h2 = jnp.maximum(z2, 0.0).astype(w3_ref.dtype)

    # Layer 3: Linear.
    z3 = jnp.dot(h2, w3_ref[...], preferred_element_type=jnp.float32) + b3_ref[...]

    # Numerically stable softmax over the feature (last) axis == torch dim=1.
    # Padded classes carry a -1e30 bias, so their exp() is exactly 0 and they do
    # not perturb the normalization.
    z3 = z3 - jnp.max(z3, axis=-1, keepdims=True)
    e = jnp.exp(z3)
    inv = pl.reciprocal(jnp.sum(e, axis=-1, keepdims=True), approx=True)
    o_ref[...] = (e * inv).astype(o_ref.dtype)


def _round_up(n, m):
    return ((n + m - 1) // m) * m


def _choose_tile_m(n):
    """Batch tile: multiple of 8; 256 MXU-sized rows (>=2 grid steps) for large
    batches, the whole (padded) batch for tiny ones."""
    if n <= 256:
        return _round_up(max(n, 1), SUBLANE)
    return 256


def _estimate_vmem_bytes(tile_m, d_in_p, h1_p, h2_p, d_out_p,
                         matmul_bytes, out_bytes, weight_bufs):
    x_tiles = 2 * tile_m * d_in_p * matmul_bytes           # double-buffered input tile
    out_tiles = 2 * tile_m * d_out_p * out_bytes           # double-buffered output tile
    weights = weight_bufs * matmul_bytes * (
        d_in_p * h1_p + h1_p * h2_p + h2_p * d_out_p)
    biases = 2 * 4 * (h1_p + h2_p + d_out_p)
    interm = 4 * tile_m * (h1_p + h2_p + 2 * d_out_p)      # f32 z1/z2/z3/e live values
    total = x_tiles + out_tiles + weights + biases + interm
    total = int(total * 1.5) + (2 << 20)                   # compiler headroom
    return max(min(total, 64 << 20), 8 << 20)              # never above v7x physical VMEM


def two_layer_net_forward(x, w1, b1, w2, b2, w3, b3, *, tile_m=None,
                          matmul_dtype=jnp.bfloat16):
    """Forward pass of TwoLayerNet.  Weights are (in, out); biases (1, out) or (out,)."""
    N, D_in = x.shape
    H1 = w1.shape[1]
    H2 = w2.shape[1]
    D_out = w3.shape[1]
    out_dtype = x.dtype

    # Pad feature dims to lane multiples (128) and the batch to a tile multiple
    # so all blocks are MXU/vreg aligned and the output store is lane-dense.
    d_in_p, h1_p, h2_p, d_out_p = (
        _round_up(d, LANE) for d in (D_in, H1, H2, D_out))
    if tile_m is None:
        tile_m = _choose_tile_m(N)
    tile_m = _round_up(tile_m, SUBLANE)
    n_p = _round_up(N, tile_m)
    grid = (n_p // tile_m,)

    md = matmul_dtype
    xp = jnp.zeros((n_p, d_in_p), md).at[:N, :D_in].set(x.astype(md))
    w1p = jnp.zeros((d_in_p, h1_p), md).at[:D_in, :H1].set(w1.astype(md))
    w2p = jnp.zeros((h1_p, h2_p), md).at[:H1, :H2].set(w2.astype(md))
    w3p = jnp.zeros((h2_p, d_out_p), md).at[:H2, :D_out].set(w3.astype(md))
    b1p = jnp.zeros((1, h1_p), jnp.float32).at[:, :H1].set(
        jnp.reshape(b1, (1, H1)).astype(jnp.float32))
    b2p = jnp.zeros((1, h2_p), jnp.float32).at[:, :H2].set(
        jnp.reshape(b2, (1, H2)).astype(jnp.float32))
    # Padded output classes get a huge negative bias so softmax ignores them.
    b3p = jnp.full((1, d_out_p), NEG_INF, jnp.float32).at[:, :D_out].set(
        jnp.reshape(b3, (1, D_out)).astype(jnp.float32))

    def run(single_buffer_weights):
        if single_buffer_weights:
            # Constant index_map -> the weights are VMEM-resident across the
            # whole grid; one buffer is enough (halves weight VMEM footprint).
            def wspec(shape):
                return pl.BlockSpec(shape, lambda i: (0, 0),
                                    pipeline_mode=pl.Buffered(1))
            weight_bufs = 1
        else:
            def wspec(shape):
                return pl.BlockSpec(shape, lambda i: (0, 0))
            weight_bufs = 2

        in_specs = [
            pl.BlockSpec((tile_m, d_in_p), lambda i: (i, 0)),
            wspec((d_in_p, h1_p)),
            wspec((1, h1_p)),
            wspec((h1_p, h2_p)),
            wspec((1, h2_p)),
            wspec((h2_p, d_out_p)),
            wspec((1, d_out_p)),
        ]
        out_specs = pl.BlockSpec((tile_m, d_out_p), lambda i: (i, 0))

        vmem_bytes = _estimate_vmem_bytes(
            tile_m, d_in_p, h1_p, h2_p, d_out_p,
            jnp.dtype(md).itemsize, jnp.dtype(out_dtype).itemsize, weight_bufs)

        return pl.pallas_call(
            mlp_softmax_kernel,
            out_shape=jax.ShapeDtypeStruct((n_p, d_out_p), out_dtype),
            grid_spec=pltpu.PrefetchScalarGridSpec(
                num_scalar_prefetch=0,
                grid=grid,
                in_specs=in_specs,
                out_specs=out_specs,
            ),
            compiler_params=pltpu.CompilerParams(
                dimension_semantics=("parallel",),
                vmem_limit_bytes=vmem_bytes,
            ),
        )(xp, w1p, b1p, w2p, b2p, w3p, b3p)

    try:
        yp = run(single_buffer_weights=True)
    except Exception:  # pragma: no cover - Pallas build without Buffered(1) support
        yp = run(single_buffer_weights=False)

    return yp[:N, :D_out]


def init_linear_params(key, fan_in, fan_out, dtype=jnp.float32):
    """PyTorch-style init: U(-1/sqrt(fan_in), +1/sqrt(fan_in)); weight returned
    already transposed to (fan_in, fan_out)."""
    kw, kb = jax.random.split(key)
    bound = 1.0 / jnp.sqrt(jnp.asarray(fan_in, dtype))
    w = jax.random.uniform(kw, (fan_in, fan_out), dtype, -bound, bound)
    b = jax.random.uniform(kb, (1, fan_out), dtype, -bound, bound)
    return w, b


def reference_forward(x, w1, b1, w2, b2, w3, b3, matmul_dtype=jnp.float32):
    md = matmul_dtype
    f32 = jnp.float32
    h1 = jnp.maximum(
        jnp.dot(x.astype(md), w1.astype(md), preferred_element_type=f32)
        + b1.astype(f32), 0.0)
    h2 = jnp.maximum(
        jnp.dot(h1.astype(md), w2.astype(md), preferred_element_type=f32)
        + b2.astype(f32), 0.0)
    z = jnp.dot(h2.astype(md), w3.astype(md), preferred_element_type=f32) \
        + b3.astype(f32)
    return jax.nn.softmax(z, axis=1)


if __name__ == "__main__":
    # Small shapes consistent with the module's (D_in, H1, H2, D_out) signature.
    # N=20 is deliberately not a multiple of 8 to exercise the batch padding.
    N, D_in, H1, H2, D_out = 20, 32, 64, 32, 8

    key = jax.random.PRNGKey(0)
    kx, k1, k2, k3 = jax.random.split(key, 4)

    x = jax.random.normal(kx, (N, D_in), jnp.float32)
    w1, b1 = init_linear_params(k1, D_in, H1)
    w2, b2 = init_linear_params(k2, H1, H2)
    w3, b3 = init_linear_params(k3, H2, D_out)

    # Default tiling (grid of 1 step at this tiny batch).
    y = two_layer_net_forward(x, w1, b1, w2, b2, w3, b3)
    y = jax.block_until_ready(y)
    assert y.shape == (N, D_out)

    # Multi-step grid (tile_m=8 -> 3 grid steps) must give the same answer.
    y_multi = two_layer_net_forward(x, w1, b1, w2, b2, w3, b3, tile_m=8)
    y_multi = jax.block_until_ready(y_multi)
    assert jnp.allclose(y, y_multi, atol=1e-5, rtol=1e-5)

    # Same-math reference (bf16 matmul inputs, f32 accumulation + softmax).
    y_ref_bf16 = reference_forward(x, w1, b1, w2, b2, w3, b3,
                                   matmul_dtype=jnp.bfloat16)
    assert jnp.allclose(y, y_ref_bf16, atol=2e-3, rtol=2e-2)

    # Loose check against the full-f32 reference (bf16 matmul rounding only).
    y_ref_f32 = reference_forward(x, w1, b1, w2, b2, w3, b3)
    assert jnp.allclose(y, y_ref_f32, atol=5e-2, rtol=5e-2)

    # Rows sum to 1 up to the approx-reciprocal (EUP) precision.
    assert jnp.allclose(jnp.sum(y, axis=1), jnp.ones((N,)), atol=5e-3)

    print("KERNEL_OK")
</pallas_src>

<mosaic_0001>
module attributes {stable_mosaic.version = 11 : i64} {
  func.func @mlp_softmax_kernel(%arg0: i32, %arg1: memref<24x128xbf16, #tpu.memory_space<vmem>>, %arg2: memref<128x128xbf16, #tpu.memory_space<vmem>>, %arg3: memref<1x128xf32, #tpu.memory_space<vmem>>, %arg4: memref<128x128xbf16, #tpu.memory_space<vmem>>, %arg5: memref<1x128xf32, #tpu.memory_space<vmem>>, %arg6: memref<128x128xbf16, #tpu.memory_space<vmem>>, %arg7: memref<1x128xf32, #tpu.memory_space<vmem>>, %arg8: memref<24x128xf32, #tpu.memory_space<vmem>>) attributes {dimension_semantics = [#tpu.dimension_semantics<parallel>], iteration_bounds = array<i64: 1>, scalar_prefetch = 0 : i64, scratch_operands = 0 : i64, tpu.core_type = #tpu.core_type<tc>, window_params = [{transform_indices = @transform_0, window_bounds = array<i64: 24, 128>}, {pipeline_mode = #tpu.pipeline_mode<synchronous>, transform_indices = @transform_1, window_bounds = array<i64: 128, 128>}, {pipeline_mode = #tpu.pipeline_mode<synchronous>, transform_indices = @transform_2, window_bounds = array<i64: 1, 128>}, {pipeline_mode = #tpu.pipeline_mode<synchronous>, transform_indices = @transform_3, window_bounds = array<i64: 128, 128>}, {pipeline_mode = #tpu.pipeline_mode<synchronous>, transform_indices = @transform_4, window_bounds = array<i64: 1, 128>}, {pipeline_mode = #tpu.pipeline_mode<synchronous>, transform_indices = @transform_5, window_bounds = array<i64: 128, 128>}, {pipeline_mode = #tpu.pipeline_mode<synchronous>, transform_indices = @transform_6, window_bounds = array<i64: 1, 128>}, {transform_indices = @transform_7, window_bounds = array<i64: 24, 128>}]} {
    %c0 = arith.constant 0 : index
    %c0_0 = arith.constant 0 : index
    %0 = vector.load %arg1[%c0, %c0_0] : memref<24x128xbf16, #tpu.memory_space<vmem>>, vector<24x128xbf16>
    %c0_1 = arith.constant 0 : index
    %c0_2 = arith.constant 0 : index
    %1 = vector.load %arg2[%c0_1, %c0_2] : memref<128x128xbf16, #tpu.memory_space<vmem>>, vector<128x128xbf16>
    %cst = arith.constant dense<0.000000e+00> : vector<24x128xf32>
    %2 = tpu.matmul %0, %1, %cst {dimension_numbers = #tpu.dot_dimension_numbers<[1], [0], [0], [1], [0, 0, 1, 1], [], []>} : vector<24x128xbf16>, vector<128x128xbf16>, vector<24x128xf32> -> vector<24x128xf32>
    %c0_3 = arith.constant 0 : index
    %c0_4 = arith.constant 0 : index
    %3 = vector.load %arg3[%c0_3, %c0_4] : memref<1x128xf32, #tpu.memory_space<vmem>>, vector<1x128xf32>
    %4 = vector.broadcast %3 : vector<1x128xf32> to vector<24x128xf32>
    %5 = arith.addf %2, %4 : vector<24x128xf32>
    %cst_5 = arith.constant 0.000000e+00 : f32
    %6 = vector.broadcast %cst_5 : f32 to vector<24x128xf32>
    %7 = arith.maximumf %5, %6 : vector<24x128xf32>
    %8 = arith.truncf %7 : vector<24x128xf32> to vector<24x128xbf16>
    %c0_6 = arith.constant 0 : index
    %c0_7 = arith.constant 0 : index
    %9 = vector.load %arg4[%c0_6, %c0_7] : memref<128x128xbf16, #tpu.memory_space<vmem>>, vector<128x128xbf16>
    %cst_8 = arith.constant dense<0.000000e+00> : vector<24x128xf32>
    %10 = tpu.matmul %8, %9, %cst_8 {dimension_numbers = #tpu.dot_dimension_numbers<[1], [0], [0], [1], [0, 0, 1, 1], [], []>} : vector<24x128xbf16>, vector<128x128xbf16>, vector<24x128xf32> -> vector<24x128xf32>
    %c0_9 = arith.constant 0 : index
    %c0_10 = arith.constant 0 : index
    %11 = vector.load %arg5[%c0_9, %c0_10] : memref<1x128xf32, #tpu.memory_space<vmem>>, vector<1x128xf32>
    %12 = vector.broadcast %11 : vector<1x128xf32> to vector<24x128xf32>
    %13 = arith.addf %10, %12 : vector<24x128xf32>
    %cst_11 = arith.constant 0.000000e+00 : f32
    %14 = vector.broadcast %cst_11 : f32 to vector<24x128xf32>
    %15 = arith.maximumf %13, %14 : vector<24x128xf32>
    %16 = arith.truncf %15 : vector<24x128xf32> to vector<24x128xbf16>
    %c0_12 = arith.constant 0 : index
    %c0_13 = arith.constant 0 : index
    %17 = vector.load %arg6[%c0_12, %c0_13] : memref<128x128xbf16, #tpu.memory_space<vmem>>, vector<128x128xbf16>
    %cst_14 = arith.constant dense<0.000000e+00> : vector<24x128xf32>
    %18 = tpu.matmul %16, %17, %cst_14 {dimension_numbers = #tpu.dot_dimension_numbers<[1], [0], [0], [1], [0, 0, 1, 1], [], []>} : vector<24x128xbf16>, vector<128x128xbf16>, vector<24x128xf32> -> vector<24x128xf32>
    %c0_15 = arith.constant 0 : index
    %c0_16 = arith.constant 0 : index
    %19 = vector.load %arg7[%c0_15, %c0_16] : memref<1x128xf32, #tpu.memory_space<vmem>>, vector<1x128xf32>
    %20 = vector.broadcast %19 : vector<1x128xf32> to vector<24x128xf32>
    %21 = arith.addf %18, %20 : vector<24x128xf32>
    %cst_17 = arith.constant dense<0xFF800000> : vector<24xf32>
    %22 = vector.multi_reduction <maximumf>, %21, %cst_17 [1] : vector<24x128xf32> to vector<24xf32>
    %23 = vector.shape_cast %22 : vector<24xf32> to vector<24x1xf32>
    %24 = vector.broadcast %23 : vector<24x1xf32> to vector<24x128xf32>
    %25 = arith.subf %21, %24 : vector<24x128xf32>
    %26 = math.exp %25 : vector<24x128xf32>
    %cst_18 = arith.constant dense<0.000000e+00> : vector<24xf32>
    %27 = vector.multi_reduction <add>, %26, %cst_18 [1] : vector<24x128xf32> to vector<24xf32>
    %28 = vector.shape_cast %27 : vector<24xf32> to vector<24x1xf32>
    %29 = tpu.reciprocal %28 {approx = true} : vector<24x1xf32> -> vector<24x1xf32>
    %30 = vector.broadcast %29 : vector<24x1xf32> to vector<24x128xf32>
    %31 = arith.mulf %26, %30 : vector<24x128xf32>
    %c0_19 = arith.constant 0 : index
    %c0_20 = arith.constant 0 : index
    %32 = vector.load %arg8[%c0_19, %c0_20] : memref<24x128xf32, #tpu.memory_space<vmem>>, vector<24x128xf32>
    tpu.vector_store %arg8[%c0_19, %c0_20], %31 {strides = array<i32>} : memref<24x128xf32, #tpu.memory_space<vmem>>, vector<24x128xf32>,
    return
  }
  func.func @transform_0(%arg0: i32) -> (i32, i32) {
    %c0_i32 = arith.constant 0 : i32
    %c0_i32_0 = arith.constant 0 : i32
    return %arg0, %c0_i32 : i32, i32
  }
  func.func @transform_1(%arg0: i32) -> (i32, i32) {
    %c0_i32 = arith.constant 0 : i32
    %c0_i32_0 = arith.constant 0 : i32
    %c0_i32_1 = arith.constant 0 : i32
    return %c0_i32, %c0_i32_0 : i32, i32
  }
  func.func @transform_2(%arg0: i32) -> (i32, i32) {
    %c0_i32 = arith.constant 0 : i32
    %c0_i32_0 = arith.constant 0 : i32
    %c0_i32_1 = arith.constant 0 : i32
    return %c0_i32, %c0_i32_0 : i32, i32
  }
  func.func @transform_3(%arg0: i32) -> (i32, i32) {
    %c0_i32 = arith.constant 0 : i32
    %c0_i32_0 = arith.constant 0 : i32
    %c0_i32_1 = arith.constant 0 : i32
    return %c0_i32, %c0_i32_0 : i32, i32
  }
  func.func @transform_4(%arg0: i32) -> (i32, i32) {
    %c0_i32 = arith.constant 0 : i32
    %c0_i32_0 = arith.constant 0 : i32
    %c0_i32_1 = arith.constant 0 : i32
    return %c0_i32, %c0_i32_0 : i32, i32
  }
  func.func @transform_5(%arg0: i32) -> (i32, i32) {
    %c0_i32 = arith.constant 0 : i32
    %c0_i32_0 = arith.constant 0 : i32
    %c0_i32_1 = arith.constant 0 : i32
    return %c0_i32, %c0_i32_0 : i32, i32
  }
  func.func @transform_6(%arg0: i32) -> (i32, i32) {
    %c0_i32 = arith.constant 0 : i32
    %c0_i32_0 = arith.constant 0 : i32
    %c0_i32_1 = arith.constant 0 : i32
    return %c0_i32, %c0_i32_0 : i32, i32
  }
  func.func @transform_7(%arg0: i32) -> (i32, i32) {
    %c0_i32 = arith.constant 0 : i32
    %c0_i32_0 = arith.constant 0 : i32
    return %arg0, %c0_i32 : i32, i32
  }
}

module attributes {stable_mosaic.version = 11 : i64} {
  func.func @mlp_softmax_kernel(%arg0: i32, %arg1: memref<24x128xbf16, #tpu.memory_space<vmem>>, %arg2: memref<128x128xbf16, #tpu.memory_space<vmem>>, %arg3: memref<1x128xf32, #tpu.memory_space<vmem>>, %arg4: memref<128x128xbf16, #tpu.memory_space<vmem>>, %arg5: memref<1x128xf32, #tpu.memory_space<vmem>>, %arg6: memref<128x128xbf16, #tpu.memory_space<vmem>>, %arg7: memref<1x128xf32, #tpu.memory_space<vmem>>, %arg8: memref<24x128xf32, #tpu.memory_space<vmem>>) attributes {dimension_semantics = [#tpu.dimension_semantics<parallel>], iteration_bounds = array<i64: 1>, scalar_prefetch = 0 : i64, scratch_operands = 0 : i64, tpu.core_type = #tpu.core_type<tc>, window_params = [{transform_indices = @transform_0, window_bounds = array<i64: 24, 128>}, {pipeline_mode = #tpu.pipeline_mode<synchronous>, transform_indices = @transform_1, window_bounds = array<i64: 128, 128>}, {pipeline_mode = #tpu.pipeline_mode<synchronous>, transform_indices = @transform_2, window_bounds = array<i64: 1, 128>}, {pipeline_mode = #tpu.pipeline_mode<synchronous>, transform_indices = @transform_3, window_bounds = array<i64: 128, 128>}, {pipeline_mode = #tpu.pipeline_mode<synchronous>, transform_indices = @transform_4, window_bounds = array<i64: 1, 128>}, {pipeline_mode = #tpu.pipeline_mode<synchronous>, transform_indices = @transform_5, window_bounds = array<i64: 128, 128>}, {pipeline_mode = #tpu.pipeline_mode<synchronous>, transform_indices = @transform_6, window_bounds = array<i64: 1, 128>}, {transform_indices = @transform_7, window_bounds = array<i64: 24, 128>}]} {
    %c0 = arith.constant 0 : index
    %c0_0 = arith.constant 0 : index
    %0 = vector.load %arg1[%c0, %c0_0] : memref<24x128xbf16, #tpu.memory_space<vmem>>, vector<24x128xbf16>
    %c0_1 = arith.constant 0 : index
    %c0_2 = arith.constant 0 : index
    %1 = vector.load %arg2[%c0_1, %c0_2] : memref<128x128xbf16, #tpu.memory_space<vmem>>, vector<128x128xbf16>
    %cst = arith.constant dense<0.000000e+00> : vector<24x128xf32>
    %2 = tpu.matmul %0, %1, %cst {dimension_numbers = #tpu.dot_dimension_numbers<[1], [0], [0], [1], [0, 0, 1, 1], [], []>} : vector<24x128xbf16>, vector<128x128xbf16>, vector<24x128xf32> -> vector<24x128xf32>
    %c0_3 = arith.constant 0 : index
    %c0_4 = arith.constant 0 : index
    %3 = vector.load %arg3[%c0_3, %c0_4] : memref<1x128xf32, #tpu.memory_space<vmem>>, vector<1x128xf32>
    %4 = vector.broadcast %3 : vector<1x128xf32> to vector<24x128xf32>
    %5 = arith.addf %2, %4 : vector<24x128xf32>
    %cst_5 = arith.constant 0.000000e+00 : f32
    %6 = vector.broadcast %cst_5 : f32 to vector<24x128xf32>
    %7 = arith.maximumf %5, %6 : vector<24x128xf32>
    %8 = arith.truncf %7 : vector<24x128xf32> to vector<24x128xbf16>
    %c0_6 = arith.constant 0 : index
    %c0_7 = arith.constant 0 : index
    %9 = vector.load %arg4[%c0_6, %c0_7] : memref<128x128xbf16, #tpu.memory_space<vmem>>, vector<128x128xbf16>
    %cst_8 = arith.constant dense<0.000000e+00> : vector<24x128xf32>
    %10 = tpu.matmul %8, %9, %cst_8 {dimension_numbers = #tpu.dot_dimension_numbers<[1], [0], [0], [1], [0, 0, 1, 1], [], []>} : vector<24x128xbf16>, vector<128x128xbf16>, vector<24x128xf32> -> vector<24x128xf32>
    %c0_9 = arith.constant 0 : index
    %c0_10 = arith.constant 0 : index
    %11 = vector.load %arg5[%c0_9, %c0_10] : memref<1x128xf32, #tpu.memory_space<vmem>>, vector<1x128xf32>
    %12 = vector.broadcast %11 : vector<1x128xf32> to vector<24x128xf32>
    %13 = arith.addf %10, %12 : vector<24x128xf32>
    %cst_11 = arith.constant 0.000000e+00 : f32
    %14 = vector.broadcast %cst_11 : f32 to vector<24x128xf32>
    %15 = arith.maximumf %13, %14 : vector<24x128xf32>
    %16 = arith.truncf %15 : vector<24x128xf32> to vector<24x128xbf16>
    %c0_12 = arith.constant 0 : index
    %c0_13 = arith.constant 0 : index
    %17 = vector.load %arg6[%c0_12, %c0_13] : memref<128x128xbf16, #tpu.memory_space<vmem>>, vector<128x128xbf16>
    %cst_14 = arith.constant dense<0.000000e+00> : vector<24x128xf32>
    %18 = tpu.matmul %16, %17, %cst_14 {dimension_numbers = #tpu.dot_dimension_numbers<[1], [0], [0], [1], [0, 0, 1, 1], [], []>} : vector<24x128xbf16>, vector<128x128xbf16>, vector<24x128xf32> -> vector<24x128xf32>
    %c0_15 = arith.constant 0 : index
    %c0_16 = arith.constant 0 : index
    %19 = vector.load %arg7[%c0_15, %c0_16] : memref<1x128xf32, #tpu.memory_space<vmem>>, vector<1x128xf32>
    %20 = vector.broadcast %19 : vector<1x128xf32> to vector<24x128xf32>
    %21 = arith.addf %18, %20 : vector<24x128xf32>
    %cst_17 = arith.constant dense<0xFF800000> : vector<24xf32>
    %22 = vector.multi_reduction <maximumf>, %21, %cst_17 [1] : vector<24x128xf32> to vector<24xf32>
    %23 = vector.shape_cast %22 : vector<24xf32> to vector<24x1xf32>
    %24 = vector.broadcast %23 : vector<24x1xf32> to vector<24x128xf32>
    %25 = arith.subf %21, %24 : vector<24x128xf32>
    %26 = math.exp %25 : vector<24x128xf32>
    %cst_18 = arith.constant dense<0.000000e+00> : vector<24xf32>
    %27 = vector.multi_reduction <add>, %26, %cst_18 [1] : vector<24x128xf32> to vector<24xf32>
    %28 = vector.shape_cast %27 : vector<24xf32> to vector<24x1xf32>
    %29 = tpu.reciprocal %28 {approx = true} : vector<24x1xf32> -> vector<24x1xf32>
    %30 = vector.broadcast %29 : vector<24x1xf32> to vector<24x128xf32>
    %31 = arith.mulf %26, %30 : vector<24x128xf32>
    %c0_19 = arith.constant 0 : index
    %c0_20 = arith.constant 0 : index
    %32 = vector.load %arg8[%c0_19, %c0_20] : memref<24x128xf32, #tpu.memory_space<vmem>>, vector<24x128xf32>
    tpu.vector_store %arg8[%c0_19, %c0_20], %31 {strides = array<i32>} : memref<24x128xf32, #tpu.memory_space<vmem>>, vector<24x128xf32>,
    return
  }
  func.func @transform_0(%arg0: i32) -> (i32, i32) {
    %c0_i32 = arith.constant 0 : i32
    %c0_i32_0 = arith.constant 0 : i32
    return %arg0, %c0_i32 : i32, i32
  }
  func.func @transform_1(%arg0: i32) -> (i32, i32) {
    %c0_i32 = arith.constant 0 : i32
    %c0_i32_0 = arith.constant 0 : i32
    %c0_i32_1 = arith.constant 0 : i32
    return %c0_i32, %c0_i32_0 : i32, i32
  }
  func.func @transform_2(%arg0: i32) -> (i32, i32) {
    %c0_i32 = arith.constant 0 : i32
    %c0_i32_0 = arith.constant 0 : i32
    %c0_i32_1 = arith.constant 0 : i32
    return %c0_i32, %c0_i32_0 : i32, i32
  }
  func.func @transform_3(%arg0: i32) -> (i32, i32) {
    %c0_i32 = arith.constant 0 : i32
    %c0_i32_0 = arith.constant 0 : i32
    %c0_i32_1 = arith.constant 0 : i32
    return %c0_i32, %c0_i32_0 : i32, i32
  }
  func.func @transform_4(%arg0: i32) -> (i32, i32) {
    %c0_i32 = arith.constant 0 : i32
    %c0_i32_0 = arith.constant 0 : i32
    %c0_i32_1 = arith.constant 0 : i32
    return %c0_i32, %c0_i32_0 : i32, i32
  }
  func.func @transform_5(%arg0: i32) -> (i32, i32) {
    %c0_i32 = arith.constant 0 : i32
    %c0_i32_0 = arith.constant 0 : i32
    %c0_i32_1 = arith.constant 0 : i32
    return %c0_i32, %c0_i32_0 : i32, i32
  }
  func.func @transform_6(%arg0: i32) -> (i32, i32) {
    %c0_i32 = arith.constant 0 : i32
    %c0_i32_0 = arith.constant 0 : i32
    %c0_i32_1 = arith.constant 0 : i32
    return %c0_i32, %c0_i32_0 : i32, i32
  }
  func.func @transform_7(%arg0: i32) -> (i32, i32) {
    %c0_i32 = arith.constant 0 : i32
    %c0_i32_0 = arith.constant 0 : i32
    return %arg0, %c0_i32 : i32, i32
  }
}

</mosaic_0001>

<bundles_post_ra>
// kernel: tpu_custom_call.1
= control target key start
LH: loop header
LB: loop body
LE: loop exit
PB: predicated region body
PF: predicated region fallthrough
CT: control target
= control target key end

     0   :  { %12 = vsyncpa [#allocation3], 0  ;;  %s780_s0 = inlined_call_operand.hbm [shape: bf16[24,128], index: 0, kind: input, shape index: {}]   ;;  %s781_s1 = inlined_call_operand.hbm [shape: bf16[128,128], index: 1, kind: input, shape index: {}]   ;;  %s782_s2 = inlined_call_operand.vmem [shape: f32[1,128], index: 2, kind: input, shape index: {}]   ;;  %s783_s3 = inlined_call_operand.hbm [shape: bf16[128,128], index: 3, kind: input, shape index: {}]   ;;  %s784_s4 = inlined_call_operand.vmem [shape: f32[1,128], index: 4, kind: input, shape index: {}]   ;;  %s785_s5 = inlined_call_operand.hbm [shape: bf16[128,128], index: 5, kind: input, shape index: {}]   ;;  %s786_s6 = inlined_call_operand.vmem [shape: f32[1,128], index: 6, kind: input, shape index: {}]   ;;  %s787_s7 = inlined_call_operand.hbm [shape: f32[24,128], index: 7, kind: output, shape index: {}]  }
   0x1   :  { %13 = vsyncpa [#allocation6], 0 }
   0x2   :  { %14 = vsyncpa [#allocation9], 0 }
   0x3   :  { %15 = vsyncpa [#allocation4], 0  ;;  %s33_s26 = sshll.u32 %s781_s1, 4  ;;  %s707_s27 = smov [#allocation5]   ;;  %s34_s26 = int_to_ptr.hbm [resolvable:$true] %s33_s26 }
   0x4   :  { %s35_s28 = sshll.u32 %s707_s27, 4  ;;  %s20_s8 = sshll.u32 %s780_s0, 4  ;;  %s36_s28 = int_to_ptr.vmem [resolvable:$true] %s35_s28  ;;  %s21_s8 = int_to_ptr.hbm [resolvable:$true] %s20_s8 }
   0x5   :  { %s708_s9 = smov 64   ;;  %s709_s10 = smov 4  }
   0x6   :  { %41 = dma.hbm_to_vmem [thread:$0]  %s34_s26, 1024, %s36_s28, [#allocation6], %s708_s9, %s708_s9, %s709_s10  }
   0x7   :  { %s710_s11 = smov [#allocation2]   ;;  %s48_s15 = sshll.u32 %s783_s3, 4  ;;  %s49_s15 = int_to_ptr.hbm [resolvable:$true] %s48_s15 }
   0x8   :  { %s22_s12 = sshll.u32 %s710_s11, 4  ;;  %s63_s17 = sshll.u32 %s785_s5, 4  ;;  %s23_s12 = int_to_ptr.vmem [resolvable:$true] %s22_s12  ;;  %s64_s17 = int_to_ptr.hbm [resolvable:$true] %s63_s17 }
   0x9   :  { %28 = dma.hbm_to_vmem [thread:$0]  %s21_s8, 192, %s23_s12, [#allocation3], %s708_s9, %s708_s9, %s709_s10  }
   0xa   :  { %s711_s18 = smov [#allocation7]   ;;  %s712_s0 = smov [#allocation8]  }
   0xb   :  { %s50_s19 = sshll.u32 %s711_s18, 4  ;;  %s65_s20 = sshll.u32 %s712_s0, 4  ;;  %s51_s19 = int_to_ptr.vmem [resolvable:$true] %s50_s19  ;;  %s66_s20 = int_to_ptr.vmem [resolvable:$true] %s65_s20 }
   0xc   :  { %56 = dma.hbm_to_vmem [thread:$0]  %s49_s15, 1024, %s51_s19, [#allocation6], %s708_s9, %s708_s9, %s709_s10  }
   0xd   :  { %71 = dma.hbm_to_vmem [thread:$0]  %s64_s17, 1024, %s66_s20, [#allocation9], %s708_s9, %s708_s9, %s709_s10  }
   0xe   :  { %699 = dma.done.wait [#allocation3], 192  }
   0xf   :  { %700 = vsyncadd [#allocation3], 4294967104 }
  0x10   :  { %701 = dma.done.wait [#allocation6], 2048  }
  0x11   :  { %702 = vsyncadd [#allocation6], 4294965248 }
  0x12   :  { %703 = dma.done.wait [#allocation9], 1024  }
  0x13   :  { %704 = vsyncadd [#allocation9], 4294966272  ;;  %v530_v0 = vld [vmem:[#allocation5 + $0x38] sm:$0xff]  ;;  %v529_v1 = vld [vmem:[#allocation5 + $0x30] sm:$0xff]  ;;  %s407_s26 = sshll.u32 %s787_s7, 4  ;;  %s714_s27 = smov 128   ;;  %s408_s26 = int_to_ptr.hbm [resolvable:$true] %s407_s26 }
  0x14   :  { %171 = vmatpush.bf16.msra.mxu0 %v530_v0  ;;  %547 = vmatpush.bf16.msra.mxu3 %v530_v0  ;;  %v538_v2 = vld [vmem:[#allocation7 + $0x38] sm:$0xff]  ;;  %v537_v3 = vld [vmem:[#allocation7 + $0x30] sm:$0xff]  ;;  %v528_v4 = vld [vmem:[#allocation5 + $0x28] sm:$0xff]  ;;  %s715_s28 = smov 8  }
  0x15   :  { %262 = vmatpush.bf16.msra.mxu1 %v538_v2  ;;  %v536_v5 = vld [vmem:[#allocation7 + $0x28] sm:$0xff]  ;;  %v527_v6 = vld [vmem:[#allocation5 + $0x20] sm:$0xff]  ;;  %v526_v8 = vld [vmem:[#allocation5 + $0x18] sm:$0xff] }
  0x16   :  { %v535_v7 = vld [vmem:[#allocation7 + $0x20] sm:$0xff]  ;;  %v525_v9 = vld [vmem:[#allocation5 + $0x10] sm:$0xff]  ;;  %v524_v10 = vld [vmem:[#allocation5 + $0x8] sm:$0xff] }
  0x17   :  { %v92_v11 = vld [vmem:[#allocation2 + $0x8] sm:$0xf]  ;;  %v523_v13 = vld [vmem:[#allocation5] sm:$0xff]  ;;  %v522_v14 = vld [vmem:[#allocation2] sm:$0xff] }
  0x18   :  { %172 = vmatpush.bf16.msra.mxu0 %v529_v1  ;;  %548 = vmatpush.bf16.msra.mxu3 %v529_v1  ;;  %v118_v12 = vunpack.c.l.b16 %v92_v11  ;;  %v534_v16 = vld [vmem:[#allocation7 + $0x18] sm:$0xff]  ;;  %v533_v17 = vld [vmem:[#allocation7 + $0x10] sm:$0xff]  ;;  %v532_v18 = vld [vmem:[#allocation7 + $0x8] sm:$0xff] }
  0x19   :  { %263 = vmatpush.bf16.msra.mxu1 %v537_v3  ;;  %v531_v19 = vld [vmem:[#allocation7] sm:$0xff]  ;;  %v546_v20 = vld [vmem:[#allocation8 + $0x38] sm:$0xff]  ;;  %v545_v22 = vld [vmem:[#allocation8 + $0x30] sm:$0xff] }
  0x1a   :  { %v120_v15 = vpack.c.b16 %v118_v12, %v118_v12  ;;  %353 = vmatpush.bf16.msra.mxu2 %v546_v20  ;;  %v564_v23 = vld [vmem:[%s782_s2] ss:$0 sm:$0xff]  ;;  %v544_v24 = vld [vmem:[#allocation8 + $0x28] sm:$0xff]  ;;  %v543_v29 = vld [vmem:[#allocation8 + $0x20] sm:$0xff] }
  0x1b   :  { %v542_v37 = vld [vmem:[#allocation8 + $0x18] sm:$0xff]  ;;  %v541_v38 = vld [vmem:[#allocation8 + $0x10] sm:$0xff]  ;;  %v540_v39 = vld [vmem:[#allocation8 + $0x8] sm:$0xff] }
  0x1c   :  { %173 = vmatpush.bf16.msra.mxu0 %v528_v4  ;;  %549 = vmatpush.bf16.msra.mxu3 %v528_v4  ;;  %v539_v40 = vld [vmem:[#allocation8] sm:$0xff]  ;;  %v565_v42 = vld [vmem:[%s784_s4] ss:$0 sm:$0xff]  ;;  %s713_s4 = smov [#allocation10]  }
  0x1d   :  { %264 = vmatpush.bf16.msra.mxu1 %v536_v5  ;;  %v566_v54 = vld [vmem:[%s786_s6] ss:$0 sm:$0xff]  ;;  %s405_s6 = sshll.u32 %s713_s4, 4  ;;  %s406_s6 = int_to_ptr.vmem [resolvable:$true] %s405_s6 }
  0x1e   :  { %354 = vmatpush.bf16.msra.mxu2 %v545_v22 }
  0x20   :  { %174 = vmatpush.bf16.msra.mxu0 %v527_v6  ;;  %550 = vmatpush.bf16.msra.mxu3 %v527_v6 }
  0x21   :  { %265 = vmatpush.bf16.msra.mxu1 %v535_v7 }
  0x22   :  { %355 = vmatpush.bf16.msra.mxu2 %v544_v24 }
  0x24   :  { %175 = vmatpush.bf16.msra.mxu0 %v526_v8  ;;  %551 = vmatpush.bf16.msra.mxu3 %v526_v8 }
  0x25   :  { %266 = vmatpush.bf16.msra.mxu1 %v534_v16 }
  0x26   :  { %356 = vmatpush.bf16.msra.mxu2 %v543_v29 }
  0x28   :  { %176 = vmatpush.bf16.msra.mxu0 %v525_v9  ;;  %552 = vmatpush.bf16.msra.mxu3 %v525_v9 }
  0x29   :  { %267 = vmatpush.bf16.msra.mxu1 %v533_v17 }
  0x2a   :  { %357 = vmatpush.bf16.msra.mxu2 %v542_v37 }
  0x2c   :  { %177 = vmatpush.bf16.msra.mxu0 %v524_v10  ;;  %553 = vmatpush.bf16.msra.mxu3 %v524_v10 }
  0x2d   :  { %268 = vmatpush.bf16.msra.mxu1 %v532_v18 }
  0x2e   :  { %358 = vmatpush.bf16.msra.mxu2 %v541_v38 }
  0x30   :  { %178 = vmatpush.bf16.msra.mxu0 %v523_v13  ;;  %554 = vmatpush.bf16.msra.mxu3 %v523_v13 }
  0x31   :  { %269 = vmatpush.bf16.msra.mxu1 %v531_v19 }
  0x32   :  { %359 = vmatpush.bf16.msra.mxu2 %v540_v39 }
  0x33   :  { %179 = vmatmul.bf16.vlgmr.msra.gmra.mxu0 %v522_v14  ;;  %184 = vmatmul.bf16.vlgmr.msra.gmra.mxu3 %v120_v15 }
  0x36   :  { %360 = vmatpush.bf16.msra.mxu2 %v539_v40 }
  0xb0   :  { %v180_v21 = vpop.f32.mrf.mxu0 }
  0xb1   :  { %v181_v26 = vadd.f32 %v564_v23, %v180_v21 }
  0xb3   :  { %v189_v30 = vmax.f32 %v181_v26, 0.0 }
  0xb6   :  { %v185_v25 = vpop.f32.mrf.mxu3 }
  0xb7   :  { %v186_v34 = vadd.f32 %v564_v23, %v185_v25 }
  0xb8   :  { %v182_v27 = vpop.f32.mrf.mxu0 }
  0xb9   :  { %v183_v28 = vadd.f32 %v564_v23, %v182_v27  ;;  %v191_v35 = vmax.f32 %v186_v34, 0.0 }
  0xbb   :  { %v190_v31 = vmax.f32 %v183_v28, 0.0  ;;  %v193_v36 = vpack.c.bf16 %v191_v35, %v191_v35 }
  0xbd   :  { %v192_v32 = vpack.c.bf16 %v190_v31, %v189_v30 }
  0xbe   :  { %v187_v33 = vpop.f32.mrf.mxu3 }
  0xbf   :  { %270 = vmatmul.bf16.vlgmr.msra.gmra.mxu1 %v192_v32 }
  0xcf   :  { %275 = vmatmul.bf16.gmra.mxu1 %v193_v36 }
 0x13c   :  { %v271_v41 = vpop.f32.mrf.mxu1 }
 0x13d   :  { %v272_v43 = vadd.f32 %v565_v42, %v271_v41 }
 0x13f   :  { %v280_v46 = vmax.f32 %v272_v43, 0.0 }
 0x144   :  { %v273_v44 = vpop.f32.mrf.mxu1 }
 0x145   :  { %v274_v45 = vadd.f32 %v565_v42, %v273_v44 }
 0x147   :  { %v281_v47 = vmax.f32 %v274_v45, 0.0 }
 0x149   :  { %v283_v48 = vpack.c.bf16 %v281_v47, %v280_v46 }
 0x14b   :  { %361 = vmatmul.bf16.vlgmr.msra.gmra.mxu2 %v283_v48 }
 0x14c   :  { %v276_v49 = vpop.f32.mrf.mxu1 }
 0x14d   :  { %v277_v50 = vadd.f32 %v565_v42, %v276_v49 }
 0x14f   :  { %v282_v51 = vmax.f32 %v277_v50, 0.0 }
 0x151   :  { %v284_v53 = vpack.c.bf16 %v282_v51, %v282_v51 }
 0x154   :  { %v278_v52 = vpop.f32.mrf.mxu1 }
 0x15b   :  { %366 = vmatmul.bf16.gmra.mxu2 %v284_v53 }
 0x1ce   :  { %v362_v55 = vpop.f32.mrf.mxu2 }
 0x1cf   :  { %v363_v56 = vadd.f32 %v566_v54, %v362_v55 }
 0x1d1   :  { %371 = vmax.xlane.f32.xlu0 %v363_v56 }
 0x1d6   :  { %v364_v57 = vpop.f32.mrf.mxu2 }
 0x1d7   :  { %v365_v58 = vadd.f32 %v566_v54, %v364_v57 }
 0x1d9   :  { %373 = vmax.xlane.f32.xlu0 %v365_v58 }
 0x1de   :  { %v367_v59 = vpop.f32.mrf.mxu2 }
 0x1df   :  { %v368_v60 = vadd.f32 %v566_v54, %v367_v59 }
 0x1e1   :  { %375 = vmax.xlane.f32.xlu1 %v368_v60 }
 0x1e6   :  { %v369_v61 = vpop.f32.mrf.mxu2 }
 0x244   :  { %v372_v62 = vpop.xlane.xlu0 %371 }
 0x245   :  { %v377_v63 = vsub.f32 %v363_v56, %v372_v62 }
 0x247   :  { %v380_v0 = vmul.f32 1.442695, %v377_v63 }
 0x249   :  { %567 = vpow2.f32 %v380_v0 }
 0x24c   :  { %v374_v1 = vpop.xlane.xlu0 %373 }
 0x24d   :  { %v378_v2 = vsub.f32 %v365_v58, %v374_v1 }
 0x24f   :  { %v568_v3 = vpop.eup %567  ;;  %v382_v4 = vmul.f32 1.442695, %v378_v2 }
 0x250   :  { %386 = vadd.xlane.f32.xlu1 %v568_v3 }
 0x251   :  { %569 = vpow2.f32 %v382_v4 }
 0x254   :  { %v376_v5 = vpop.xlane.xlu1 %375 }
 0x255   :  { %v379_v6 = vsub.f32 %v368_v60, %v376_v5 }
 0x257   :  { %v570_v7 = vpop.eup %569  ;;  %v384_v8 = vmul.f32 1.442695, %v379_v6 }
 0x258   :  { %388 = vadd.xlane.f32.xlu2 %v570_v7 }
 0x259   :  { %571 = vpow2.f32 %v384_v8 }
 0x25f   :  { %v572_v9 = vpop.eup %571 }
 0x260   :  { %390 = vadd.xlane.f32.xlu2 %v572_v9 }
 0x2c3   :  { %v387_v10 = vpop.xlane.xlu1 %386 }
 0x2c4   :  { %573 = vrcp.f32 %v387_v10 }
 0x2ca   :  { %v574_v11 = vpop.eup %573 }
 0x2cb   :  { %v395_v12 = vmul.f32 %v574_v11, %v568_v3  ;;  %v389_v13 = vpop.xlane.xlu2 %388 }
 0x2cc   :  { %575 = vrcp.f32 %v389_v13 }
 0x2cd   :  { %398 = vst [vmem:[#allocation10] sm:$0xff] %v395_v12 }
 0x2d2   :  { %v576_v14 = vpop.eup %575 }
 0x2d3   :  { %v396_v15 = vmul.f32 %v576_v14, %v570_v7  ;;  %v391_v16 = vpop.xlane.xlu2 %390 }
 0x2d4   :  { %577 = vrcp.f32 %v391_v16 }
 0x2d5   :  { %399 = vst [vmem:[#allocation10 + $0x8] sm:$0xff] %v396_v15 }
 0x2da   :  { %v578_v17 = vpop.eup %577 }
 0x2db   :  { %v397_v18 = vmul.f32 %v578_v17, %v572_v9 }
 0x2dd   :  { %400 = vst [vmem:[#allocation10 + $0x10] sm:$0xff] %v397_v18 }
 0x2de   :  { %413 = dma.vmem_to_hbm [thread:$0]  %s406_s6, 384, %s408_s26, [#allocation4], %s714_s27, %s714_s27, %s715_s28  }
 0x2df   :  { %705 = dma.done.wait [#allocation4], 384  }
 0x2e0   :  { %706 = vsyncadd [#allocation4], 4294966912 }
 0x2e1   :  { %418 = vsyncpa [#allocation3], 1 }
 0x2e2   :  { %419 = vsyncpa [#allocation6], 1 }
 0x2e3   :  { %420 = vsyncpa [#allocation9], 1 }
 0x2e4   :  { %421 = vsyncpa [#allocation4], 1 }

// kernel: tpu_custom_call.1
= control target key start
LH: loop header
LB: loop body
LE: loop exit
PB: predicated region body
PF: predicated region fallthrough
CT: control target
= control target key end

     0   :  { %12 = vsyncpa [#allocation3], 0  ;;  %s780_s0 = inlined_call_operand.hbm [shape: bf16[24,128], index: 0, kind: input, shape index: {}]   ;;  %s781_s1 = inlined_call_operand.hbm [shape: bf16[128,128], index: 1, kind: input, shape index: {}]   ;;  %s782_s2 = inlined_call_operand.vmem [shape: f32[1,128], index: 2, kind: input, shape index: {}]   ;;  %s783_s3 = inlined_call_operand.hbm [shape: bf16[128,128], index: 3, kind: input, shape index: {}]   ;;  %s784_s4 = inlined_call_operand.vmem [shape: f32[1,128], index: 4, kind: input, shape index: {}]   ;;  %s785_s5 = inlined_call_operand.hbm [shape: bf16[128,128], index: 5, kind: input, shape index: {}]   ;;  %s786_s6 = inlined_call_operand.vmem [shape: f32[1,128], index: 6, kind: input, shape index: {}]   ;;  %s787_s7 = inlined_call_operand.hbm [shape: f32[24,128], index: 7, kind: output, shape index: {}]  }
   0x1   :  { %13 = vsyncpa [#allocation6], 0 }
   0x2   :  { %14 = vsyncpa [#allocation9], 0 }
   0x3   :  { %15 = vsyncpa [#allocation4], 0  ;;  %s33_s26 = sshll.u32 %s781_s1, 4  ;;  %s707_s27 = smov [#allocation5]   ;;  %s34_s26 = int_to_ptr.hbm [resolvable:$true] %s33_s26 }
   0x4   :  { %s35_s28 = sshll.u32 %s707_s27, 4  ;;  %s20_s8 = sshll.u32 %s780_s0, 4  ;;  %s36_s28 = int_to_ptr.vmem [resolvable:$true] %s35_s28  ;;  %s21_s8 = int_to_ptr.hbm [resolvable:$true] %s20_s8 }
   0x5   :  { %s708_s9 = smov 64   ;;  %s709_s10 = smov 4  }
   0x6   :  { %41 = dma.hbm_to_vmem [thread:$0]  %s34_s26, 1024, %s36_s28, [#allocation6], %s708_s9, %s708_s9, %s709_s10  }
   0x7   :  { %s710_s11 = smov [#allocation2]   ;;  %s48_s15 = sshll.u32 %s783_s3, 4  ;;  %s49_s15 = int_to_ptr.hbm [resolvable:$true] %s48_s15 }
   0x8   :  { %s22_s12 = sshll.u32 %s710_s11, 4  ;;  %s63_s17 = sshll.u32 %s785_s5, 4  ;;  %s23_s12 = int_to_ptr.vmem [resolvable:$true] %s22_s12  ;;  %s64_s17 = int_to_ptr.hbm [resolvable:$true] %s63_s17 }
   0x9   :  { %28 = dma.hbm_to_vmem [thread:$0]  %s21_s8, 192, %s23_s12, [#allocation3], %s708_s9, %s708_s9, %s709_s10  }
   0xa   :  { %s711_s18 = smov [#allocation7]   ;;  %s712_s0 = smov [#allocation8]  }
   0xb   :  { %s50_s19 = sshll.u32 %s711_s18, 4  ;;  %s65_s20 = sshll.u32 %s712_s0, 4  ;;  %s51_s19 = int_to_ptr.vmem [resolvable:$true] %s50_s19  ;;  %s66_s20 = int_to_ptr.vmem [resolvable:$true] %s65_s20 }
   0xc   :  { %56 = dma.hbm_to_vmem [thread:$0]  %s49_s15, 1024, %s51_s19, [#allocation6], %s708_s9, %s708_s9, %s709_s10  }
   0xd   :  { %71 = dma.hbm_to_vmem [thread:$0]  %s64_s17, 1024, %s66_s20, [#allocation9], %s708_s9, %s708_s9, %s709_s10  }
   0xe   :  { %699 = dma.done.wait [#allocation3], 192  }
   0xf   :  { %700 = vsyncadd [#allocation3], 4294967104 }
  0x10   :  { %701 = dma.done.wait [#allocation6], 2048  }
  0x11   :  { %702 = vsyncadd [#allocation6], 4294965248 }
  0x12   :  { %703 = dma.done.wait [#allocation9], 1024  }
  0x13   :  { %704 = vsyncadd [#allocation9], 4294966272  ;;  %v530_v0 = vld [vmem:[#allocation5 + $0x38] sm:$0xff]  ;;  %v529_v1 = vld [vmem:[#allocation5 + $0x30] sm:$0xff]  ;;  %s407_s26 = sshll.u32 %s787_s7, 4  ;;  %s714_s27 = smov 128   ;;  %s408_s26 = int_to_ptr.hbm [resolvable:$true] %s407_s26 }
  0x14   :  { %171 = vmatpush.bf16.msra.mxu0 %v530_v0  ;;  %547 = vmatpush.bf16.msra.mxu3 %v530_v0  ;;  %v538_v2 = vld [vmem:[#allocation7 + $0x38] sm:$0xff]  ;;  %v537_v3 = vld [vmem:[#allocation7 + $0x30] sm:$0xff]  ;;  %v528_v4 = vld [vmem:[#allocation5 + $0x28] sm:$0xff]  ;;  %s715_s28 = smov 8  }
  0x15   :  { %262 = vmatpush.bf16.msra.mxu1 %v538_v2  ;;  %v536_v5 = vld [vmem:[#allocation7 + $0x28] sm:$0xff]  ;;  %v527_v6 = vld [vmem:[#allocation5 + $0x20] sm:$0xff]  ;;  %v526_v8 = vld [vmem:[#allocation5 + $0x18] sm:$0xff] }
  0x16   :  { %v535_v7 = vld [vmem:[#allocation7 + $0x20] sm:$0xff]  ;;  %v525_v9 = vld [vmem:[#allocation5 + $0x10] sm:$0xff]  ;;  %v524_v10 = vld [vmem:[#allocation5 + $0x8] sm:$0xff] }
  0x17   :  { %v92_v11 = vld [vmem:[#allocation2 + $0x8] sm:$0xf]  ;;  %v523_v13 = vld [vmem:[#allocation5] sm:$0xff]  ;;  %v522_v14 = vld [vmem:[#allocation2] sm:$0xff] }
  0x18   :  { %172 = vmatpush.bf16.msra.mxu0 %v529_v1  ;;  %548 = vmatpush.bf16.msra.mxu3 %v529_v1  ;;  %v118_v12 = vunpack.c.l.b16 %v92_v11  ;;  %v534_v16 = vld [vmem:[#allocation7 + $0x18] sm:$0xff]  ;;  %v533_v17 = vld [vmem:[#allocation7 + $0x10] sm:$0xff]  ;;  %v532_v18 = vld [vmem:[#allocation7 + $0x8] sm:$0xff] }
  0x19   :  { %263 = vmatpush.bf16.msra.mxu1 %v537_v3  ;;  %v531_v19 = vld [vmem:[#allocation7] sm:$0xff]  ;;  %v546_v20 = vld [vmem:[#allocation8 + $0x38] sm:$0xff]  ;;  %v545_v22 = vld [vmem:[#allocation8 + $0x30] sm:$0xff] }
  0x1a   :  { %v120_v15 = vpack.c.b16 %v118_v12, %v118_v12  ;;  %353 = vmatpush.bf16.msra.mxu2 %v546_v20  ;;  %v564_v23 = vld [vmem:[%s782_s2] ss:$0 sm:$0xff]  ;;  %v544_v24 = vld [vmem:[#allocation8 + $0x28] sm:$0xff]  ;;  %v543_v29 = vld [vmem:[#allocation8 + $0x20] sm:$0xff] }
  0x1b   :  { %v542_v37 = vld [vmem:[#allocation8 + $0x18] sm:$0xff]  ;;  %v541_v38 = vld [vmem:[#allocation8 + $0x10] sm:$0xff]  ;;  %v540_v39 = vld [vmem:[#allocation8 + $0x8] sm:$0xff] }
  0x1c   :  { %173 = vmatpush.bf16.msra.mxu0 %v528_v4  ;;  %549 = vmatpush.bf16.msra.mxu3 %v528_v4  ;;  %v539_v40 = vld [vmem:[#allocation8] sm:$0xff]  ;;  %v565_v42 = vld [vmem:[%s784_s4] ss:$0 sm:$0xff]  ;;  %s713_s4 = smov [#allocation10]  }
  0x1d   :  { %264 = vmatpush.bf16.msra.mxu1 %v536_v5  ;;  %v566_v54 = vld [vmem:[%s786_s6] ss:$0 sm:$0xff]  ;;  %s405_s6 = sshll.u32 %s713_s4, 4  ;;  %s406_s6 = int_to_ptr.vmem [resolvable:$true] %s405_s6 }
  0x1e   :  { %354 = vmatpush.bf16.msra.mxu2 %v545_v22 }
  0x20   :  { %174 = vmatpush.bf16.msra.mxu0 %v527_v6  ;;  %550 = vmatpush.bf16.msra.mxu3 %v527_v6 }
  0x21   :  { %265 = vmatpush.bf16.msra.mxu1 %v535_v7 }
  0x22   :  { %355 = vmatpush.bf16.msra.mxu2 %v544_v24 }
  0x24   :  { %175 = vmatpush.bf16.msra.mxu0 %v526_v8  ;;  %551 = vmatpush.bf16.msra.mxu3 %v526_v8 }
  0x25   :  { %266 = vmatpush.bf16.msra.mxu1 %v534_v16 }
  0x26   :  { %356 = vmatpush.bf16.msra.mxu2 %v543_v29 }
  0x28   :  { %176 = vmatpush.bf16.msra.mxu0 %v525_v9  ;;  %552 = vmatpush.bf16.msra.mxu3 %v525_v9 }
  0x29   :  { %267 = vmatpush.bf16.msra.mxu1 %v533_v17 }
  0x2a   :  { %357 = vmatpush.bf16.msra.mxu2 %v542_v37 }
  0x2c   :  { %177 = vmatpush.bf16.msra.mxu0 %v524_v10  ;;  %553 = vmatpush.bf16.msra.mxu3 %v524_v10 }
  0x2d   :  { %268 = vmatpush.bf16.msra.mxu1 %v532_v18 }
  0x2e   :  { %358 = vmatpush.bf16.msra.mxu2 %v541_v38 }
  0x30   :  { %178 = vmatpush.bf16.msra.mxu0 %v523_v13  ;;  %554 = vmatpush.bf16.msra.mxu3 %v523_v13 }
  0x31   :  { %269 = vmatpush.bf16.msra.mxu1 %v531_v19 }
  0x32   :  { %359 = vmatpush.bf16.msra.mxu2 %v540_v39 }
  0x33   :  { %179 = vmatmul.bf16.vlgmr.msra.gmra.mxu0 %v522_v14  ;;  %184 = vmatmul.bf16.vlgmr.msra.gmra.mxu3 %v120_v15 }
  0x36   :  { %360 = vmatpush.bf16.msra.mxu2 %v539_v40 }
  0xb0   :  { %v180_v21 = vpop.f32.mrf.mxu0 }
  0xb1   :  { %v181_v26 = vadd.f32 %v564_v23, %v180_v21 }
  0xb3   :  { %v189_v30 = vmax.f32 %v181_v26, 0.0 }
  0xb6   :  { %v185_v25 = vpop.f32.mrf.mxu3 }
  0xb7   :  { %v186_v34 = vadd.f32 %v564_v23, %v185_v25 }
  0xb8   :  { %v182_v27 = vpop.f32.mrf.mxu0 }
  0xb9   :  { %v183_v28 = vadd.f32 %v564_v23, %v182_v27  ;;  %v191_v35 = vmax.f32 %v186_v34, 0.0 }
  0xbb   :  { %v190_v31 = vmax.f32 %v183_v28, 0.0  ;;  %v193_v36 = vpack.c.bf16 %v191_v35, %v191_v35 }
  0xbd   :  { %v192_v32 = vpack.c.bf16 %v190_v31, %v189_v30 }
  0xbe   :  { %v187_v33 = vpop.f32.mrf.mxu3 }
  0xbf   :  { %270 = vmatmul.bf16.vlgmr.msra.gmra.mxu1 %v192_v32 }
  0xcf   :  { %275 = vmatmul.bf16.gmra.mxu1 %v193_v36 }
 0x13c   :  { %v271_v41 = vpop.f32.mrf.mxu1 }
 0x13d   :  { %v272_v43 = vadd.f32 %v565_v42, %v271_v41 }
 0x13f   :  { %v280_v46 = vmax.f32 %v272_v43, 0.0 }
 0x144   :  { %v273_v44 = vpop.f32.mrf.mxu1 }
 0x145   :  { %v274_v45 = vadd.f32 %v565_v42, %v273_v44 }
 0x147   :  { %v281_v47 = vmax.f32 %v274_v45, 0.0 }
 0x149   :  { %v283_v48 = vpack.c.bf16 %v281_v47, %v280_v46 }
 0x14b   :  { %361 = vmatmul.bf16.vlgmr.msra.gmra.mxu2 %v283_v48 }
 0x14c   :  { %v276_v49 = vpop.f32.mrf.mxu1 }
 0x14d   :  { %v277_v50 = vadd.f32 %v565_v42, %v276_v49 }
 0x14f   :  { %v282_v51 = vmax.f32 %v277_v50, 0.0 }
 0x151   :  { %v284_v53 = vpack.c.bf16 %v282_v51, %v282_v51 }
 0x154   :  { %v278_v52 = vpop.f32.mrf.mxu1 }
 0x15b   :  { %366 = vmatmul.bf16.gmra.mxu2 %v284_v53 }
 0x1ce   :  { %v362_v55 = vpop.f32.mrf.mxu2 }
 0x1cf   :  { %v363_v56 = vadd.f32 %v566_v54, %v362_v55 }
 0x1d1   :  { %371 = vmax.xlane.f32.xlu0 %v363_v56 }
 0x1d6   :  { %v364_v57 = vpop.f32.mrf.mxu2 }
 0x1d7   :  { %v365_v58 = vadd.f32 %v566_v54, %v364_v57 }
 0x1d9   :  { %373 = vmax.xlane.f32.xlu0 %v365_v58 }
 0x1de   :  { %v367_v59 = vpop.f32.mrf.mxu2 }
 0x1df   :  { %v368_v60 = vadd.f32 %v566_v54, %v367_v59 }
 0x1e1   :  { %375 = vmax.xlane.f32.xlu1 %v368_v60 }
 0x1e6   :  { %v369_v61 = vpop.f32.mrf.mxu2 }
 0x244   :  { %v372_v62 = vpop.xlane.xlu0 %371 }
 0x245   :  { %v377_v63 = vsub.f32 %v363_v56, %v372_v62 }
 0x247   :  { %v380_v0 = vmul.f32 1.442695, %v377_v63 }
 0x249   :  { %567 = vpow2.f32 %v380_v0 }
 0x24c   :  { %v374_v1 = vpop.xlane.xlu0 %373 }
 0x24d   :  { %v378_v2 = vsub.f32 %v365_v58, %v374_v1 }
 0x24f   :  { %v568_v3 = vpop.eup %567  ;;  %v382_v4 = vmul.f32 1.442695, %v378_v2 }
 0x250   :  { %386 = vadd.xlane.f32.xlu1 %v568_v3 }
 0x251   :  { %569 = vpow2.f32 %v382_v4 }
 0x254   :  { %v376_v5 = vpop.xlane.xlu1 %375 }
 0x255   :  { %v379_v6 = vsub.f32 %v368_v60, %v376_v5 }
 0x257   :  { %v570_v7 = vpop.eup %569  ;;  %v384_v8 = vmul.f32 1.442695, %v379_v6 }
 0x258   :  { %388 = vadd.xlane.f32.xlu2 %v570_v7 }
 0x259   :  { %571 = vpow2.f32 %v384_v8 }
 0x25f   :  { %v572_v9 = vpop.eup %571 }
 0x260   :  { %390 = vadd.xlane.f32.xlu2 %v572_v9 }
 0x2c3   :  { %v387_v10 = vpop.xlane.xlu1 %386 }
 0x2c4   :  { %573 = vrcp.f32 %v387_v10 }
 0x2ca   :  { %v574_v11 = vpop.eup %573 }
 0x2cb   :  { %v395_v12 = vmul.f32 %v574_v11, %v568_v3  ;;  %v389_v13 = vpop.xlane.xlu2 %388 }
 0x2cc   :  { %575 = vrcp.f32 %v389_v13 }
 0x2cd   :  { %398 = vst [vmem:[#allocation10] sm:$0xff] %v395_v12 }
 0x2d2   :  { %v576_v14 = vpop.eup %575 }
 0x2d3   :  { %v396_v15 = vmul.f32 %v576_v14, %v570_v7  ;;  %v391_v16 = vpop.xlane.xlu2 %390 }
 0x2d4   :  { %577 = vrcp.f32 %v391_v16 }
 0x2d5   :  { %399 = vst [vmem:[#allocation10 + $0x8] sm:$0xff] %v396_v15 }
 0x2da   :  { %v578_v17 = vpop.eup %577 }
 0x2db   :  { %v397_v18 = vmul.f32 %v578_v17, %v572_v9 }
 0x2dd   :  { %400 = vst [vmem:[#allocation10 + $0x10] sm:$0xff] %v397_v18 }
 0x2de   :  { %413 = dma.vmem_to_hbm [thread:$0]  %s406_s6, 384, %s408_s26, [#allocation4], %s714_s27, %s714_s27, %s715_s28  }
 0x2df   :  { %705 = dma.done.wait [#allocation4], 384  }
 0x2e0   :  { %706 = vsyncadd [#allocation4], 4294966912 }
 0x2e1   :  { %418 = vsyncpa [#allocation3], 1 }
 0x2e2   :  { %419 = vsyncpa [#allocation6], 1 }
 0x2e3   :  { %420 = vsyncpa [#allocation9], 1 }
 0x2e4   :  { %421 = vsyncpa [#allocation4], 1 }

</bundles_post_ra>
